<compile_context>
chip_gen: v6e
topology: v6e:2x2x1
jax: 0.10.0
libtpu: 0.0.40
codegen_flags: <defaults>
</compile_context>

<pallas_src>
import jax
import jax.numpy as jnp
from jax.experimental import pallas as pl
from jax.experimental.pallas import tpu as pltpu

_LANES = 128


def _round_up(n, m):
    return ((n + m - 1) // m) * m


def critic_mlp_kernel(xT_ref, w1t_ref, b1t_ref, w2t_ref, b2t_ref, w3t_ref,
                      b3t_ref, out_ref):
    """Fused 3-layer MLP tile in transposed (batch-on-lanes) layout.

    Computes  y^T = W3^T @ relu(W2^T @ relu(W1^T @ x^T + b1) + b2) + b3
    where x^T tile is (in_dim, TM) and the output tile is (out_dim, TM).
    """
    # Layer 1: (h, in) @ (in, TM) -> (h, TM).  Cast activations to the weight
    # dtype (no-op for f32, native bf16 MXU path for bf16 weights); accumulate
    # in f32; bias/ReLU in f32.
    h1 = jnp.dot(w1t_ref[...], xT_ref[...].astype(w1t_ref.dtype),
                 preferred_element_type=jnp.float32)
    h1 = jnp.maximum(h1 + b1t_ref[...].astype(jnp.float32), 0.0)

    # Layer 2: (h, h) @ (h, TM) -> (h, TM).
    h2 = jnp.dot(w2t_ref[...], h1.astype(w2t_ref.dtype),
                 preferred_element_type=jnp.float32)
    h2 = jnp.maximum(h2 + b2t_ref[...].astype(jnp.float32), 0.0)

    # Layer 3: (out, h) @ (h, TM) -> (out, TM).  Lane-dense, unpadded store.
    y = jnp.dot(w3t_ref[...], h2.astype(w3t_ref.dtype),
                preferred_element_type=jnp.float32)
    y = y + b3t_ref[...].astype(jnp.float32)

    out_ref[...] = y.astype(out_ref.dtype)


def critic_forward(x, params, *, tile_m=2048):
    """Run the fused critic MLP on TPU via pallas_call.

    x: (batch, input_dim)
    params: w1 (in,h), b1 (1,h), w2 (h,h), b2 (1,h), w3 (h,out), b3 (1,out)
            (weights may be float32 or bfloat16)
    Returns float32 (batch, out_dim).
    """
    batch, in_dim = x.shape
    hidden = params["w1"].shape[1]
    out_dim = params["w3"].shape[1]

    # Pre-transpose the (tiny) weights / biases once: features on sublanes.
    w1t = params["w1"].T                       # (h, in)
    w2t = params["w2"].T                       # (h, h)
    w3t = params["w3"].T                       # (out, h)
    b1t = params["b1"].reshape(hidden, 1)      # (h, 1) -> lane-broadcast in kernel
    b2t = params["b2"].reshape(hidden, 1)
    b3t = params["b3"].reshape(out_dim, 1)

    # Batch tiling: batch lives on the lane axis, so tiles are multiples of 128.
    b128 = _round_up(batch, _LANES)
    tm = min(_round_up(tile_m, _LANES), b128)
    if b128 > _LANES:
        # Keep at least 2 grid tiles so both v7x TensorCores get work.
        tm = min(tm, _round_up(pl.cdiv(b128, 2), _LANES))
    padded_b = _round_up(b128, tm)
    n_tiles = padded_b // tm

    xT = x.T                                   # (in, batch): batch on lanes
    if padded_b != batch:
        xT = jnp.pad(xT, ((0, 0), (0, padded_b - batch)))

    def resident(a):
        # Full-extent block with a constant index -> DMA'd once, VMEM-resident
        # across all grid steps.
        return pl.BlockSpec(a.shape, lambda i: (0,) * a.ndim)

    outT = pl.pallas_call(
        critic_mlp_kernel,
        out_shape=jax.ShapeDtypeStruct((out_dim, padded_b), jnp.float32),
        grid=(n_tiles,),
        in_specs=[
            pl.BlockSpec((in_dim, tm), lambda i: (0, i)),   # x^T tile
            resident(w1t), resident(b1t),
            resident(w2t), resident(b2t),
            resident(w3t), resident(b3t),
        ],
        out_specs=pl.BlockSpec((out_dim, tm), lambda i: (0, i)),
        compiler_params=pltpu.CompilerParams(
            dimension_semantics=("parallel",)),  # v7x: shard batch over 2 TCs
    )(xT, w1t, b1t, w2t, b2t, w3t, b3t)

    # Back to (batch, out_dim); out_dim is tiny (1 for a critic) so this is cheap.
    return outT[:, :batch].T


def init_critic_params(key, input_dim, output_dim, hidden_dim,
                       dtype=jnp.float32):
    """Deterministic init mirroring PyTorch nn.Linear defaults:
    U(-1/sqrt(fan_in), +1/sqrt(fan_in)) for both weights and biases."""
    keys = jax.random.split(key, 6)

    def linear(kw, kb, fan_in, fan_out):
        bound = 1.0 / jnp.sqrt(float(fan_in))
        w = jax.random.uniform(kw, (fan_in, fan_out), jnp.float32,
                               minval=-bound, maxval=bound).astype(dtype)
        b = jax.random.uniform(kb, (1, fan_out), jnp.float32,
                               minval=-bound, maxval=bound).astype(dtype)
        return w, b

    w1, b1 = linear(keys[0], keys[1], input_dim, hidden_dim)
    w2, b2 = linear(keys[2], keys[3], hidden_dim, hidden_dim)
    w3, b3 = linear(keys[4], keys[5], hidden_dim, output_dim)
    return dict(w1=w1, b1=b1, w2=w2, b2=b2, w3=w3, b3=b3)


def critic_forward_ref(x, p):
    """Pure-JAX reference (mirrors the kernel's casting/accumulation)."""
    def lin(h, w, b):
        return (jnp.dot(h.astype(w.dtype), w,
                        preferred_element_type=jnp.float32)
                + b.astype(jnp.float32))
    h1 = jnp.maximum(lin(x, p["w1"], p["b1"]), 0.0)
    h2 = jnp.maximum(lin(h1, p["w2"], p["b2"]), 0.0)
    return lin(h2, p["w3"], p["b3"])


if __name__ == "__main__":
    input_dim, hidden_dim, output_dim = 16, 32, 1
    key = jax.random.PRNGKey(0)
    kx, kp = jax.random.split(key)
    params = init_critic_params(kp, input_dim, output_dim, hidden_dim)

    # f32 path: batch large enough to exercise the batch grid (2 tiles of 128
    # after the ">= 2 tiles for v7x" clamp).
    batch = 256
    x = jax.random.normal(kx, (batch, input_dim), dtype=jnp.float32)
    out = jax.block_until_ready(critic_forward(x, params))
    ref = critic_forward_ref(x, params)
    assert out.shape == (batch, output_dim)
    assert jnp.allclose(out, ref, atol=1e-4, rtol=1e-4), \
        float(jnp.max(jnp.abs(out - ref)))

    # Ragged tiny batch: exercises the lane-padding + slicing path.
    x_small = jax.random.normal(kx, (7, input_dim), dtype=jnp.float32)
    out_small = jax.block_until_ready(critic_forward(x_small, params))
    ref_small = critic_forward_ref(x_small, params)
    assert out_small.shape == (7, output_dim)
    assert jnp.allclose(out_small, ref_small, atol=1e-4, rtol=1e-4)

    # bf16-weight path (halved weight DMA, native bf16 MXU on v6e/v7x;
    # bias/ReLU stay in f32 for v5e's VPU).
    params_bf16 = init_critic_params(kp, input_dim, output_dim, hidden_dim,
                                     dtype=jnp.bfloat16)
    out_bf16 = jax.block_until_ready(critic_forward(x, params_bf16))
    ref_bf16 = critic_forward_ref(x, params_bf16)
    assert jnp.allclose(out_bf16, ref_bf16, atol=5e-2, rtol=5e-2)

    print("KERNEL_OK")
</pallas_src>

<mosaic_0001>
module attributes {stable_mosaic.version = 11 : i64} {
  func.func @critic_mlp_kernel(%arg0: i32, %arg1: memref<16x128xf32, #tpu.memory_space<vmem>>, %arg2: memref<32x16xf32, #tpu.memory_space<vmem>>, %arg3: memref<32x1xf32, #tpu.memory_space<vmem>>, %arg4: memref<32x32xf32, #tpu.memory_space<vmem>>, %arg5: memref<32x1xf32, #tpu.memory_space<vmem>>, %arg6: memref<1x32xf32, #tpu.memory_space<vmem>>, %arg7: memref<1x1xf32, #tpu.memory_space<vmem>>, %arg8: memref<1x128xf32, #tpu.memory_space<vmem>>) attributes {dimension_semantics = [#tpu.dimension_semantics<parallel>], iteration_bounds = array<i64: 2>, scalar_prefetch = 0 : i64, scratch_operands = 0 : i64, tpu.core_type = #tpu.core_type<tc>, window_params = [{transform_indices = @transform_0, window_bounds = array<i64: 16, 128>}, {pipeline_mode = #tpu.pipeline_mode<synchronous>, transform_indices = @transform_1, window_bounds = array<i64: 32, 16>}, {pipeline_mode = #tpu.pipeline_mode<synchronous>, transform_indices = @transform_2, window_bounds = array<i64: 32, 1>}, {pipeline_mode = #tpu.pipeline_mode<synchronous>, transform_indices = @transform_3, window_bounds = array<i64: 32, 32>}, {pipeline_mode = #tpu.pipeline_mode<synchronous>, transform_indices = @transform_4, window_bounds = array<i64: 32, 1>}, {pipeline_mode = #tpu.pipeline_mode<synchronous>, transform_indices = @transform_5, window_bounds = array<i64: 1, 32>}, {pipeline_mode = #tpu.pipeline_mode<synchronous>, transform_indices = @transform_6, window_bounds = array<i64: 1, 1>}, {transform_indices = @transform_7, window_bounds = array<i64: 1, 128>}]} {
    %c0 = arith.constant 0 : index
    %c0_0 = arith.constant 0 : index
    %0 = vector.load %arg2[%c0, %c0_0] : memref<32x16xf32, #tpu.memory_space<vmem>>, vector<32x16xf32>
    %c0_1 = arith.constant 0 : index
    %c0_2 = arith.constant 0 : index
    %1 = vector.load %arg1[%c0_1, %c0_2] : memref<16x128xf32, #tpu.memory_space<vmem>>, vector<16x128xf32>
    %cst = arith.constant dense<0.000000e+00> : vector<32x128xf32>
    %2 = tpu.matmul %0, %1, %cst {dimension_numbers = #tpu.dot_dimension_numbers<[1], [0], [0], [1], [0, 0, 1, 1], [], []>} : vector<32x16xf32>, vector<16x128xf32>, vector<32x128xf32> -> vector<32x128xf32>
    %c0_3 = arith.constant 0 : index
    %c0_4 = arith.constant 0 : index
    %3 = vector.load %arg3[%c0_3, %c0_4] : memref<32x1xf32, #tpu.memory_space<vmem>>, vector<32x1xf32>
    %4 = vector.broadcast %3 : vector<32x1xf32> to vector<32x128xf32>
    %5 = arith.addf %2, %4 : vector<32x128xf32>
    %cst_5 = arith.constant 0.000000e+00 : f32
    %6 = vector.broadcast %cst_5 : f32 to vector<32x128xf32>
    %7 = arith.maximumf %5, %6 : vector<32x128xf32>
    %c0_6 = arith.constant 0 : index
    %c0_7 = arith.constant 0 : index
    %8 = vector.load %arg4[%c0_6, %c0_7] : memref<32x32xf32, #tpu.memory_space<vmem>>, vector<32x32xf32>
    %cst_8 = arith.constant dense<0.000000e+00> : vector<32x128xf32>
    %9 = tpu.matmul %8, %7, %cst_8 {dimension_numbers = #tpu.dot_dimension_numbers<[1], [0], [0], [1], [0, 0, 1, 1], [], []>} : vector<32x32xf32>, vector<32x128xf32>, vector<32x128xf32> -> vector<32x128xf32>
    %c0_9 = arith.constant 0 : index
    %c0_10 = arith.constant 0 : index
    %10 = vector.load %arg5[%c0_9, %c0_10] : memref<32x1xf32, #tpu.memory_space<vmem>>, vector<32x1xf32>
    %11 = vector.broadcast %10 : vector<32x1xf32> to vector<32x128xf32>
    %12 = arith.addf %9, %11 : vector<32x128xf32>
    %cst_11 = arith.constant 0.000000e+00 : f32
    %13 = vector.broadcast %cst_11 : f32 to vector<32x128xf32>
    %14 = arith.maximumf %12, %13 : vector<32x128xf32>
    %c0_12 = arith.constant 0 : index
    %c0_13 = arith.constant 0 : index
    %15 = vector.load %arg6[%c0_12, %c0_13] : memref<1x32xf32, #tpu.memory_space<vmem>>, vector<1x32xf32>
    %cst_14 = arith.constant dense<0.000000e+00> : vector<1x128xf32>
    %16 = tpu.matmul %15, %14, %cst_14 {dimension_numbers = #tpu.dot_dimension_numbers<[1], [0], [0], [1], [0, 0, 1, 1], [], []>} : vector<1x32xf32>, vector<32x128xf32>, vector<1x128xf32> -> vector<1x128xf32>
    %c0_15 = arith.constant 0 : index
    %c0_16 = arith.constant 0 : index
    %17 = vector.load %arg7[%c0_15, %c0_16] : memref<1x1xf32, #tpu.memory_space<vmem>>, vector<1x1xf32>
    %18 = vector.broadcast %17 : vector<1x1xf32> to vector<1x128xf32>
    %19 = arith.addf %16, %18 : vector<1x128xf32>
    %c0_17 = arith.constant 0 : index
    %c0_18 = arith.constant 0 : index
    %20 = vector.load %arg8[%c0_17, %c0_18] : memref<1x128xf32, #tpu.memory_space<vmem>>, vector<1x128xf32>
    tpu.vector_store %arg8[%c0_17, %c0_18], %19 {strides = array<i32>} : memref<1x128xf32, #tpu.memory_space<vmem>>, vector<1x128xf32>,
    return
  }
  func.func @transform_0(%arg0: i32) -> (i32, i32) {
    %c0_i32 = arith.constant 0 : i32
    %c0_i32_0 = arith.constant 0 : i32
    return %c0_i32, %arg0 : i32, i32
  }
  func.func @transform_1(%arg0: i32) -> (i32, i32) {
    %c0_i32 = arith.constant 0 : i32
    %c0_i32_0 = arith.constant 0 : i32
    %c0_i32_1 = arith.constant 0 : i32
    return %c0_i32, %c0_i32_0 : i32, i32
  }
  func.func @transform_2(%arg0: i32) -> (i32, i32) {
    %c0_i32 = arith.constant 0 : i32
    %c0_i32_0 = arith.constant 0 : i32
    %c0_i32_1 = arith.constant 0 : i32
    return %c0_i32, %c0_i32_0 : i32, i32
  }
  func.func @transform_3(%arg0: i32) -> (i32, i32) {
    %c0_i32 = arith.constant 0 : i32
    %c0_i32_0 = arith.constant 0 : i32
    %c0_i32_1 = arith.constant 0 : i32
    return %c0_i32, %c0_i32_0 : i32, i32
  }
  func.func @transform_4(%arg0: i32) -> (i32, i32) {
    %c0_i32 = arith.constant 0 : i32
    %c0_i32_0 = arith.constant 0 : i32
    %c0_i32_1 = arith.constant 0 : i32
    return %c0_i32, %c0_i32_0 : i32, i32
  }
  func.func @transform_5(%arg0: i32) -> (i32, i32) {
    %c0_i32 = arith.constant 0 : i32
    %c0_i32_0 = arith.constant 0 : i32
    %c0_i32_1 = arith.constant 0 : i32
    return %c0_i32, %c0_i32_0 : i32, i32
  }
  func.func @transform_6(%arg0: i32) -> (i32, i32) {
    %c0_i32 = arith.constant 0 : i32
    %c0_i32_0 = arith.constant 0 : i32
    %c0_i32_1 = arith.constant 0 : i32
    return %c0_i32, %c0_i32_0 : i32, i32
  }
  func.func @transform_7(%arg0: i32) -> (i32, i32) {
    %c0_i32 = arith.constant 0 : i32
    %c0_i32_0 = arith.constant 0 : i32
    return %c0_i32, %arg0 : i32, i32
  }
}

</mosaic_0001>

<bundles_post_ra>
// kernel: tpu_custom_call.1
= control target key start
LH: loop header
LB: loop body
LE: loop exit
PB: predicated region body
PF: predicated region fallthrough
CT: control target
= control target key end

     0   :  { %s1127_s0 = inlined_call_operand.vmem [shape: f32[16,256], index: 0, kind: input, shape index: {}]   ;;  %s1128_s1 = inlined_call_operand.vmem [shape: f32[32,16], index: 1, kind: input, shape index: {}]   ;;  %s1129_s2 = inlined_call_operand.vmem [shape: f32[32,1], index: 2, kind: input, shape index: {}]   ;;  %s1130_s3 = inlined_call_operand.vmem [shape: f32[32,32], index: 3, kind: input, shape index: {}]   ;;  %s1131_s4 = inlined_call_operand.vmem [shape: f32[32,1], index: 4, kind: input, shape index: {}]   ;;  %s1132_s5 = inlined_call_operand.vmem [shape: f32[1,32], index: 5, kind: input, shape index: {}]   ;;  %s1133_s6 = inlined_call_operand.<no memory space> [shape: f32[1,1], index: 6, kind: input, shape index: {}]   ;;  %s1134_s7 = inlined_call_operand.hbm [shape: f32[1,256], index: 7, kind: output, shape index: {}]  }
   0x1   :  { %v12_v0 = vstv %s1133_s6 }
   0x2   :  { %13 = vst [vmem:[#allocation2] sm:$0x1] %v12_v0 }
   0x3   :  { %14 = vsyncpa [#allocation5], 0 }
   0x4   :  { %16 = vsyncpa [#allocation5 + $0x1], 0  ;;  %s964_s26 = smov 0   ;;  %s966_s27 = smov 0  }
   0x5   :  { %s968_s28 = smov 0   ;;  %s970_s29 = smov 0  }
   0x6 LB: > { %s737_s6 = sadd.s32 4294967295, %s915_s29   ;;  %s738_s30 = sadd.s32 4294967294, %s915_s29   ;;  %s915_s29 = sphi %s970_s29, %s1140_s29   ;;  %s911_s28 = sphi %s968_s28, %s1139_s28   ;;  %s907_s27 = sphi %s966_s27, %s1138_s27   ;;  %s903_s26 = sphi %s964_s26, %s1137_s26  }
   0x7   : > { %s987_s8 = sadd.s32 1, %s915_s29   ;;  %s29_s9 = sadd.s32 1, %s911_s28 }
   0x8   : > { %s26_s10 = ssub.s32 %s915_s29, %s987_s8  ;;  %p36_p0 = scmp.ne.s32.totalorder %s911_s28, %s907_s27 }
   0x9   : > { %p27_p1 = scmp.eq.s32.totalorder %s26_s10, 0  ;;  %p37_p2 = scmp.eq.s32.totalorder %s915_s29, 0 }
   0xa   : > { %p192_p3 = scmp.eq.s32.totalorder %s737_s6, 1  ;;  %p197_p4 = scmp.ne.s32.totalorder %s907_s27, %s903_s26 }
   0xb   : > { %s1000_s11 = scalar_select %p27_p1, %s911_s28, %s29_s9  }
   0xc   : > { %p38_p5 = por %p37_p2, %p36_p0  ;;  %p1002_p6 = por %p192_p3, %p36_p0 }
   0xd   : > { %p198_p7 = scmp.eq.s32.totalorder %s738_s30, 1  ;;  %p740_p9 = scmp.ge.s32.totalorder %s915_s29, 2 }
   0xf   : > { %p1006_p8 = por %p198_p7, %p197_p4  ;;  %232 = sbr.rel (%p740_p9) target bundleno = 25 (0x19), region = 40 }
  0x14   : > { %235 = sbr.rel (!%p38_p5) target bundleno = 25 (0x19), region = 44  ;;  %s237_s14 = sand.u32 (%p38_p5), 1, %s911_s28  }
  0x15   : > { %s742_s15 = sshll.u32 (%p38_p5), %s915_s29, 3  ;;  %s741_s16 = sshll.u32 (%p38_p5), %s237_s14, 4 }
  0x16   : > { %s241_s19 = scalar_lea.vmem (%p38_p5), %s1127_s0, %s742_s15  ;;  %s239_s20 = scalar_lea.vmem (%p38_p5), [#allocation3], %s741_s16 }
  0x17   : > { %v272_v1 = vld [vmem:[%s241_s19] sm:$0xff] (%p38_p5)  ;;  %v274_v2 = vld [vmem:[%s241_s19 + $0x10] sm:$0xff] (%p38_p5) }
  0x18   : > { %273 = vst [vmem:[%s239_s20] sm:$0xff] (%p38_p5), %v272_v1  ;;  %275 = vst [vmem:[%s239_s20 + $0x8] sm:$0xff] (%p38_p5), %v274_v2 }
  0x19 PF: > { %p743_p10 = scmp.ge.s32.totalorder %s915_s29, 1  ;;  %p280_p11 = scmp.lt.s32.totalorder %s915_s29, 3 }
  0x1b   : > { %p281_p12 = pnand %p743_p10, %p280_p11 }
  0x1c   : > { %s1021_s21 = sand.u32 (!%p281_p12), 1, %s907_s27   ;;  %s754_s15 = sshll.u32 (!%p281_p12), %s737_s6, 4 }
  0x1d   : > { %284 = sbr.rel (%p281_p12) target bundleno = 666 (0x29a), region = 82  ;;  %s744_s24 = sshll.u32 (!%p281_p12), %s1021_s21, 4 }
  0x1e   : > { %s289_s14 = scalar_lea.vmem (!%p281_p12), [#allocation3], %s744_s24  ;;  %s316_s16 = scalar_lea.vmem (!%p281_p12), [#allocation4], %s1021_s21 }
  0x1f   : > { %s677_s17 = sshll.u32 (!%p281_p12), %s316_s16, 4  ;;  %s1090_s20 = scalar_lea.hbm (!%p281_p12), %s1134_s7, %s754_s15  ;;  %s678_s17 = int_to_ptr.vmem [resolvable:$true] %s677_s17 }
  0x20   : > { %s665_s22 = scalar_lea.sflag (!%p281_p12), [#allocation5], %s1021_s21  ;;  %s855_s23 = scalar_lea.vmem (!%p281_p12), %s678_s17, 16 }
  0x21   : > { %p856_p13 = scmp.ne.s32.totalorder (!%p281_p12), %s678_s17, %s855_s23  ;;  %s920_s6 = smov (!%p281_p12), [#allocation4]  }
  0x22   : > { %v317_v3 = vld [vmem:[%s1128_s1] sm:$0xff]  ;;  %vm347_vm0 = vcmask 130048   ;;  %v917_v4 = vmov 0   ;;  %v326_v5 = vld [vmem:[%s1129_s2 + $0x18] sm:$0xff]  ;;  %v324_v6 = vld [vmem:[%s1129_s2 + $0x8] sm:$0xff]  ;;  %vm477_vm1 = vcmask 261120   ;;  %v586_v57 = vlaneseq }
  0x23   : > { %780 = vmatprep.mubr.msk.f32.mxu0 %vm347_vm0, %v317_v3  ;;  %853 = vset.pattern.permute.xlu0 %v917_v4  ;;  %v322_v7 = vld [vmem:[%s289_s14 + $0x8] sm:$0xff]  ;;  %v321_v8 = vld [vmem:[%s289_s14] sm:$0xff]  ;;  %v918_v39 = vmov 0.0   ;;  %vm919_vm2 = vmmov 0   ;;  %p857_p0 = pnand %p856_p13, %p1002_p6  ;;  %s859_s24 = sshll.u32 %s920_s6, 4  ;;  %s860_s24 = int_to_ptr.vmem [resolvable:$false] %s859_s24 }
  0x24   : > { %344 = vperm.xlu0 %853, %v326_v5   ;;  %854 = vset.pattern.permute.xlu1 %v917_v4  ;;  %v325_v9 = vld [vmem:[%s1129_s2 + $0x10] sm:$0xff]  ;;  %v323_v10 = vld [vmem:[%s1129_s2] sm:$0xff]  ;;  %v318_v11 = vld [vmem:[%s1128_s1 + $0x8] sm:$0xff]  ;;  %v587_v58 = vshrl.u32 %v586_v57, 7  ;;  %s861_s25 = scalar_lea.vmem %s860_s24, 32  ;;  %p862_p2 = scmp.lt.s32.totalorder %s678_s17, %s860_s24 }
  0x25   : > { %334 = vperm.xlu1 %854, %v324_v6   ;;  %776 = vmatprep.subr.mxu0 %v322_v7  ;;  %v319_v12 = vld [vmem:[%s1128_s1 + $0x10] sm:$0xff]  ;;  %v456_v13 = vld [vmem:[%s1131_s4 + $0x18] sm:$0xff]  ;;  %v454_v16 = vld [vmem:[%s1131_s4 + $0x8] sm:$0xff]  ;;  %p858_p1 = pneg %p857_p0  ;;  %p863_p3 = scmp.lt.s32.totalorder %s861_s25, %s855_s23 }
  0x26   : > { %777 = vmatpush3.msra.mxu0 %v322_v7  ;;  %v455_v14 = vld [vmem:[%s1131_s4 + $0x10] sm:$0xff]  ;;  %v320_v15 = vld [vmem:[%s1128_s1 + $0x18] sm:$0xff]  ;;  %v453_v17 = vld [vmem:[%s1131_s4] sm:$0xff]  ;;  %v588_v59 = vsub.s32 0, %v587_v58 }
  0x27   : > { %778 = vmatprep.subr.mxu0 %v321_v8  ;;  %v580_v18 = vld [vmem:[#allocation2] sm:$0x1]  ;;  %v450_v36 = vld [vmem:[%s1130_s3 + $0x8] sm:$0xff]  ;;  %v451_v37 = vld [vmem:[%s1130_s3 + $0x10] sm:$0xff]  ;;  %p864_p4 = por %p863_p3, %p862_p2 }
  0x28   : > { %339 = vperm.xlu0 %853, %v325_v9   ;;  %779 = vmatpush3.msra.mxu0 %v321_v8  ;;  %v449_v19 = vld [vmem:[%s1130_s3] sm:$0xff]  ;;  %v452_v38 = vld [vmem:[%s1130_s3 + $0x18] sm:$0xff] }
  0x29   : > { %329 = vperm.xlu1 %854, %v323_v10   ;;  %781 = vmatmul.mubr.msk.f32.vlgmr.msra.gmra.mxu0 %vm347_vm0, %v318_v11  ;;  %v579_v56 = vld [vmem:[%s1132_s5] sm:$0x1]  ;;  %p865_p5 = pnand %p864_p4, %p858_p1 }
  0x2a   : > { %783 = vmatprep.mubr.msk.f32.mxu0 %vm347_vm0, %v319_v12  ;;  %794 = vmatprep.mubr.msk.f32.mxu1 %vm477_vm1, %v449_v19 }
  0x2b   : > { %800 = vmatprep.subr.mxu0 %v918_v39 }
  0x2c   : > { %474 = vperm.xlu0 %853, %v456_v13  }
  0x2d   : > { %469 = vperm.xlu1 %854, %v455_v14   ;;  %784 = vmatmul.mubr.msk.f32.gmra.mxu0 %vm347_vm0, %v320_v15 }
  0x2e   : > { %808 = vmatprep.mubr.msk.f32.mxu0 %vm919_vm2, %v918_v39 }
  0x30   : > { %464 = vperm.xlu0 %853, %v454_v16  }
  0x31   : > { %459 = vperm.xlu1 %854, %v453_v17  }
  0x34   : > { %583 = vperm.xlu0 %853, %v580_v18  }
  0x9f   : > { %v345_v20 = vpop.permute.xlu0 %344 }
  0xa0   : > { %v335_v22 = vpop.permute.xlu1 %334 }
  0xa3   : > { %v340_v26 = vpop.permute.xlu0 %339 }
  0xa4   : > { %v330_v31 = vpop.permute.xlu1 %329 }
  0xa7   : > { %v475_v40 = vpop.permute.xlu0 %474 }
  0xa8   : > { %v470_v42 = vpop.permute.xlu1 %469 }
  0xab   : > { %v465_v46 = vpop.permute.xlu0 %464 }
  0xac   : > { %v460_v51 = vpop.permute.xlu1 %459 }
  0xaf   : > { %v584_v60 = vpop.permute.xlu0 %583 }
  0xb0   : > { %v589_v61 = vrot.slane %v584_v60, %v588_v59 }
  0xe9   : > { %v782_v21 = vpop.f32.mrf.mxu0 }
  0xea   : > { %v432_v28 = vadd.f32 %v782_v21, %v335_v22 }
  0xeb   : > { %v426_v23 = vpop.f32.mrf.mxu0 }
  0xec   : > { %v427_v32 = vadd.f32 %v426_v23, %v330_v31  ;;  %v446_v34 = vmax.f32 %v432_v28, 0.0 }
  0xed   : > { %v785_v24 = vpop.f32.mrf.mxu0 }
  0xee   : > { %v442_v25 = vadd.f32 %v785_v24, %v345_v20  ;;  %v445_v35 = vmax.f32 %v427_v32, 0.0 }
  0xef   : > { %v436_v27 = vpop.f32.mrf.mxu0 }
  0xf0   : > { %v448_v29 = vmax.f32 %v442_v25, 0.0  ;;  %v437_v30 = vadd.f32 %v436_v27, %v340_v26 }
  0xf2   : > { %v447_v33 = vmax.f32 %v437_v30, 0.0  ;;  %786 = vmatprep.subr.mxu1 %v448_v29 }
  0xf3   : > { %787 = vmatpush3.msra.mxu1 %v448_v29 }
  0xf4   : > { %788 = vmatprep.subr.mxu1 %v447_v33 }
  0xf5   : > { %789 = vmatpush3.msra.mxu1 %v447_v33 }
  0xf6   : > { %790 = vmatprep.subr.mxu1 %v446_v34 }
  0xf7   : > { %791 = vmatpush3.msra.mxu1 %v446_v34 }
  0xf8   : > { %792 = vmatprep.subr.mxu1 %v445_v35 }
  0xf9   : > { %793 = vmatpush3.msra.mxu1 %v445_v35 }
  0xfa   : > { %795 = vmatmul.mubr.msk.f32.vlgmr.msra.gmra.mxu1 %vm477_vm1, %v450_v36 }
  0xfb   : > { %797 = vmatprep.mubr.msk.f32.mxu1 %vm477_vm1, %v451_v37 }
  0xfe   : > { %798 = vmatmul.mubr.msk.f32.gmra.mxu1 %vm477_vm1, %v452_v38 }
 0x1ba   : > { %v796_v41 = vpop.f32.mrf.mxu1 }
 0x1bb   : > { %v562_v48 = vadd.f32 %v796_v41, %v465_v46 }
 0x1bc   : > { %v556_v43 = vpop.f32.mrf.mxu1 }
 0x1bd   : > { %v557_v52 = vadd.f32 %v556_v43, %v460_v51  ;;  %v576_v54 = vmax.f32 %v562_v48, 0.0 }
 0x1be   : > { %v799_v44 = vpop.f32.mrf.mxu1 }
 0x1bf   : > { %v572_v45 = vadd.f32 %v799_v44, %v475_v40  ;;  %v575_v55 = vmax.f32 %v557_v52, 0.0 }
 0x1c0   : > { %v566_v47 = vpop.f32.mrf.mxu1 }
 0x1c1   : > { %v578_v49 = vmax.f32 %v572_v45, 0.0  ;;  %v567_v50 = vadd.f32 %v566_v47, %v470_v42 }
 0x1c3   : > { %v577_v53 = vmax.f32 %v567_v50, 0.0  ;;  %801 = vmatpush3.msra.mxu0 %v578_v49 }
 0x1c4   : > { %802 = vmatprep.subr.mxu0 %v918_v39 }
 0x1c5   : > { %803 = vmatpush3.msra.mxu0 %v577_v53 }
 0x1c6   : > { %804 = vmatprep.subr.mxu0 %v918_v39 }
 0x1c7   : > { %805 = vmatpush3.msra.mxu0 %v576_v54 }
 0x1c8   : > { %806 = vmatprep.subr.mxu0 %v918_v39 }
 0x1c9   : > { %807 = vmatpush3.msra.mxu0 %v575_v55 }
 0x1ca   : > { %809 = vmatmul.mubr.msk.f32.vlgmr.msra.gmra.mxu0 %vm477_vm1, %v579_v56 }
 0x28a   : > { %v659_v62 = vpop.f32.mrf.mxu0 }
 0x28b   : > { %v660_v63 = vadd.f32 %v659_v62, %v589_v61 }
 0x28c   : > { %v810_v0 = vpop.f32.mrf.mxu0 }
 0x28d   : > { %663 = vst [vmem:[%s316_s16] sm:$0x1] %v660_v63 }
 0x28e   : > { %868 = shalt.err (!%p865_p5)
}
 0x28f   : > { %s869_s30 = scalar_lea.hbm %s1090_s20, 16  ;;  %s873_s10 = scalar_lea.hbm %s1134_s7, 32 }
 0x290   : > { %p870_p7 = scmp.ne.s32.totalorder %s1090_s20, %s869_s30  ;;  %p874_p12 = scmp.lt.s32.totalorder %s1090_s20, %s1134_s7 }
 0x291   : > { %p875_p13 = scmp.lt.s32.totalorder %s873_s10, %s869_s30 }
 0x292   : > { %p871_p10 = pnand %p870_p7, %p1002_p6 }
 0x293   : > { %p876_p0 = por %p875_p13, %p874_p12 }
 0x294   : > { %p872_p11 = pneg %p871_p10 }
 0x296   : > { %p877_p1 = pnand %p876_p0, %p872_p11 }
 0x298   : > { %880 = shalt.err (!%p877_p1)
}
 0x299   : > { %811 = dma.vmem_to_hbm [thread:$0]  (%p1002_p6), %s678_s17, 16, %s1090_s20, %s665_s22  }
 0x29a PF: > { %s689_s16 = sand.u32 1, %s903_s26   ;;  %p814_p2 = pnand %p740_p9, %p1006_p8 }
 0x29b   : > { %s690_s18 = scalar_lea.sflag [#allocation5], %s689_s16 }
 0x29c   : > { %p815_p3 = pneg %p814_p2 }
 0x29e   : > { %898 = dma.done.wait (%p815_p3), %s690_s18, 16  }
 0x29f   : > { %900 = vsyncadd (%p815_p3), %s690_s18, 4294967280  ;;  %p19_p4 = scmp.ge.s32.totalorder %s987_s8, 4   ;;  %s1137_s26 = smov %s907_s27 }
 0x2a0   : > { %s1138_s27 = smov %s911_s28  ;;  %s1139_s28 = smov %s1000_s11 }
 0x2a1   : > { %s1140_s29 = smov %s987_s8  ;;  %21 = sbr.rel (!%p19_p4) target bundleno = 6 (0x6), region = 126 }
 0x2a6   :  { %694 = vsyncpa [#allocation5], 1 }
 0x2a7   :  { %696 = vsyncpa [#allocation5 + $0x1], 1 }

</bundles_post_ra>
